<compile_context>
chip_gen: v7x
topology: tpu7x:2x2x1
jax: 0.10.0
libtpu: 0.0.40
codegen_flags: <defaults>
</compile_context>

<pallas_src>
import functools

import jax
import jax.numpy as jnp
from jax.experimental import pallas as pl
from jax.experimental.pallas import tpu as pltpu


MIN_ROWS = 8  # sublane granularity for the batch tile


def _round_up(n, m):
    return ((n + m - 1) // m) * m


def qnet_kernel(x_ref, w1_ref, b1_ref, w2_ref, b2_ref, w3_ref, b3_ref, o_ref):
    # One (tm, state) bf16 activation tile per grid step; weights are VMEM-resident.
    x = x_ref[...]                                                   # bf16
    h1 = jnp.dot(x, w1_ref[...], preferred_element_type=jnp.float32) + b1_ref[...]
    h1 = jnp.maximum(h1, 0.0)                                        # f32 ReLU (VPU)
    h2 = jnp.dot(h1.astype(jnp.bfloat16), w2_ref[...],
                 preferred_element_type=jnp.float32) + b2_ref[...]
    h2 = jnp.maximum(h2, 0.0)
    out = jnp.dot(h2.astype(jnp.bfloat16), w3_ref[...],
                  preferred_element_type=jnp.float32) + b3_ref[...]
    o_ref[...] = out                                                 # f32, no padding


def prepare_params(params):
    """One-time weight prep: cast weights to bf16; biases stay f32. No padding."""
    return (params["w1"].astype(jnp.bfloat16), params["b1"],
            params["w2"].astype(jnp.bfloat16), params["b2"],
            params["w3"].astype(jnp.bfloat16), params["b3"])


def _choose_tm(B, tm):
    """Batch tile: shrink for tiny batches; >= 2 grid steps once B > 16 (v7x)."""
    if B <= 2 * MIN_ROWS:
        return _round_up(B, MIN_ROWS)
    half = _round_up(pl.cdiv(B, 2), MIN_ROWS)
    return min(tm, half)


@functools.partial(jax.jit, static_argnames=("tm",))
def qnetwork_forward(x, prepared, *, tm=1024):
    """x: [B, state_size] float32; prepared: output of prepare_params()."""
    w1, b1, w2, b2, w3, b3 = prepared
    B, state_size = x.shape
    action_size = w3.shape[1]

    tm_eff = _choose_tm(B, tm)
    grid_n = pl.cdiv(B, tm_eff)
    Bp = grid_n * tm_eff                      # overshoot < 1 tile

    xb = x.astype(jnp.bfloat16)               # halve streamed HBM read
    if Bp != B:
        xb = jnp.pad(xb, ((0, Bp - B), (0, 0)))

    resident = lambda a: pl.BlockSpec(a.shape, lambda i: (0,) * a.ndim)

    out = pl.pallas_call(
        qnet_kernel,
        out_shape=jax.ShapeDtypeStruct((Bp, action_size), jnp.float32),
        grid=(grid_n,),
        in_specs=[
            pl.BlockSpec((tm_eff, state_size), lambda i: (i, 0)),    # streamed x
            resident(w1), resident(b1),
            resident(w2), resident(b2),
            resident(w3), resident(b3),
        ],
        out_specs=pl.BlockSpec((tm_eff, action_size), lambda i: (i, 0)),
        compiler_params=pltpu.CompilerParams(
            dimension_semantics=("parallel",),
        ),
    )(xb, w1, b1, w2, b2, w3, b3)

    return out if Bp == B else out[:B]


def init_params(key, state_size, action_size, hidden_dim_1=64, hidden_dim_2=128):
    """Deterministic init mimicking nn.Linear's U(-1/sqrt(fan_in), 1/sqrt(fan_in))."""
    def linear(k, fan_in, fan_out):
        kw, kb = jax.random.split(k)
        bound = 1.0 / jnp.sqrt(fan_in)
        w = jax.random.uniform(kw, (fan_in, fan_out), jnp.float32, -bound, bound)
        b = jax.random.uniform(kb, (1, fan_out), jnp.float32, -bound, bound)
        return w, b

    k1, k2, k3 = jax.random.split(key, 3)
    w1, b1 = linear(k1, state_size, hidden_dim_1)
    w2, b2 = linear(k2, hidden_dim_1, hidden_dim_2)
    w3, b3 = linear(k3, hidden_dim_2, action_size)
    return {"w1": w1, "b1": b1, "w2": w2, "b2": b2, "w3": w3, "b3": b3}


def reference_forward_f32(x, p):
    h1 = jnp.maximum(x @ p["w1"] + p["b1"], 0.0)
    h2 = jnp.maximum(h1 @ p["w2"] + p["b2"], 0.0)
    return h2 @ p["w3"] + p["b3"]


def reference_forward_bf16(x, p):
    """Matches kernel numerics: bf16 matmul inputs, f32 accumulate/elementwise."""
    bf = jnp.bfloat16
    dot = lambda a, w: jnp.dot(a.astype(bf), w.astype(bf),
                               preferred_element_type=jnp.float32)
    h1 = jnp.maximum(dot(x, p["w1"]) + p["b1"], 0.0)
    h2 = jnp.maximum(dot(h1, p["w2"]) + p["b2"], 0.0)
    return dot(h2, p["w3"]) + p["b3"]


if __name__ == "__main__":
    key = jax.random.PRNGKey(0)
    k_param, k_x = jax.random.split(key)

    batch, state_size, action_size = 2, 8, 4
    params = init_params(k_param, state_size, action_size)
    prepared = prepare_params(params)           # one-time, outside the hot path
    x = jax.random.normal(k_x, (batch, state_size), jnp.float32)

    out = qnetwork_forward(x, prepared)
    out = jax.block_until_ready(out)
    assert out.shape == (batch, action_size)

    # Tight check against a bf16-matmul reference (same numerics as the kernel).
    ref_bf16 = reference_forward_bf16(x, params)
    assert jnp.allclose(out, ref_bf16, atol=2e-3, rtol=2e-3), "mismatch vs bf16 ref"

    # Loose check against the pure-f32 reference (bf16 MXU inputs => ~1e-2 rel err).
    ref_f32 = reference_forward_f32(x, params)
    assert jnp.allclose(out, ref_f32, atol=3e-2, rtol=3e-2), "mismatch vs f32 ref"

    print("KERNEL_OK")
</pallas_src>

<mosaic_0001>
module attributes {stable_mosaic.version = 11 : i64} {
  func.func @qnet_kernel(%arg0: i32, %arg1: memref<8x8xbf16, #tpu.memory_space<vmem>>, %arg2: memref<8x64xbf16, #tpu.memory_space<vmem>>, %arg3: memref<1x64xf32, #tpu.memory_space<vmem>>, %arg4: memref<64x128xbf16, #tpu.memory_space<vmem>>, %arg5: memref<1x128xf32, #tpu.memory_space<vmem>>, %arg6: memref<128x4xbf16, #tpu.memory_space<vmem>>, %arg7: memref<1x4xf32, #tpu.memory_space<vmem>>, %arg8: memref<8x4xf32, #tpu.memory_space<vmem>>) attributes {dimension_semantics = [#tpu.dimension_semantics<parallel>], iteration_bounds = array<i64: 1>, scalar_prefetch = 0 : i64, scratch_operands = 0 : i64, tpu.core_type = #tpu.core_type<tc>, window_params = [{transform_indices = @transform_0, window_bounds = array<i64: 8, 8>}, {pipeline_mode = #tpu.pipeline_mode<synchronous>, transform_indices = @transform_1, window_bounds = array<i64: 8, 64>}, {pipeline_mode = #tpu.pipeline_mode<synchronous>, transform_indices = @transform_2, window_bounds = array<i64: 1, 64>}, {pipeline_mode = #tpu.pipeline_mode<synchronous>, transform_indices = @transform_3, window_bounds = array<i64: 64, 128>}, {pipeline_mode = #tpu.pipeline_mode<synchronous>, transform_indices = @transform_4, window_bounds = array<i64: 1, 128>}, {pipeline_mode = #tpu.pipeline_mode<synchronous>, transform_indices = @transform_5, window_bounds = array<i64: 128, 4>}, {pipeline_mode = #tpu.pipeline_mode<synchronous>, transform_indices = @transform_6, window_bounds = array<i64: 1, 4>}, {transform_indices = @transform_7, window_bounds = array<i64: 8, 4>}]} {
    %c0 = arith.constant 0 : index
    %c0_0 = arith.constant 0 : index
    %0 = vector.load %arg1[%c0, %c0_0] : memref<8x8xbf16, #tpu.memory_space<vmem>>, vector<8x8xbf16>
    %c0_1 = arith.constant 0 : index
    %c0_2 = arith.constant 0 : index
    %1 = vector.load %arg2[%c0_1, %c0_2] : memref<8x64xbf16, #tpu.memory_space<vmem>>, vector<8x64xbf16>
    %cst = arith.constant dense<0.000000e+00> : vector<8x64xf32>
    %2 = tpu.matmul %0, %1, %cst {dimension_numbers = #tpu.dot_dimension_numbers<[1], [0], [0], [1], [0, 0, 1, 1], [], []>} : vector<8x8xbf16>, vector<8x64xbf16>, vector<8x64xf32> -> vector<8x64xf32>
    %c0_3 = arith.constant 0 : index
    %c0_4 = arith.constant 0 : index
    %3 = vector.load %arg3[%c0_3, %c0_4] : memref<1x64xf32, #tpu.memory_space<vmem>>, vector<1x64xf32>
    %4 = vector.broadcast %3 : vector<1x64xf32> to vector<8x64xf32>
    %5 = arith.addf %2, %4 : vector<8x64xf32>
    %cst_5 = arith.constant 0.000000e+00 : f32
    %6 = vector.broadcast %cst_5 : f32 to vector<8x64xf32>
    %7 = arith.maximumf %5, %6 : vector<8x64xf32>
    %8 = arith.truncf %7 : vector<8x64xf32> to vector<8x64xbf16>
    %c0_6 = arith.constant 0 : index
    %c0_7 = arith.constant 0 : index
    %9 = vector.load %arg4[%c0_6, %c0_7] : memref<64x128xbf16, #tpu.memory_space<vmem>>, vector<64x128xbf16>
    %cst_8 = arith.constant dense<0.000000e+00> : vector<8x128xf32>
    %10 = tpu.matmul %8, %9, %cst_8 {dimension_numbers = #tpu.dot_dimension_numbers<[1], [0], [0], [1], [0, 0, 1, 1], [], []>} : vector<8x64xbf16>, vector<64x128xbf16>, vector<8x128xf32> -> vector<8x128xf32>
    %c0_9 = arith.constant 0 : index
    %c0_10 = arith.constant 0 : index
    %11 = vector.load %arg5[%c0_9, %c0_10] : memref<1x128xf32, #tpu.memory_space<vmem>>, vector<1x128xf32>
    %12 = vector.broadcast %11 : vector<1x128xf32> to vector<8x128xf32>
    %13 = arith.addf %10, %12 : vector<8x128xf32>
    %cst_11 = arith.constant 0.000000e+00 : f32
    %14 = vector.broadcast %cst_11 : f32 to vector<8x128xf32>
    %15 = arith.maximumf %13, %14 : vector<8x128xf32>
    %16 = arith.truncf %15 : vector<8x128xf32> to vector<8x128xbf16>
    %c0_12 = arith.constant 0 : index
    %c0_13 = arith.constant 0 : index
    %17 = vector.load %arg6[%c0_12, %c0_13] : memref<128x4xbf16, #tpu.memory_space<vmem>>, vector<128x4xbf16>
    %cst_14 = arith.constant dense<0.000000e+00> : vector<8x4xf32>
    %18 = tpu.matmul %16, %17, %cst_14 {dimension_numbers = #tpu.dot_dimension_numbers<[1], [0], [0], [1], [0, 0, 1, 1], [], []>} : vector<8x128xbf16>, vector<128x4xbf16>, vector<8x4xf32> -> vector<8x4xf32>
    %c0_15 = arith.constant 0 : index
    %c0_16 = arith.constant 0 : index
    %19 = vector.load %arg7[%c0_15, %c0_16] : memref<1x4xf32, #tpu.memory_space<vmem>>, vector<1x4xf32>
    %20 = vector.broadcast %19 : vector<1x4xf32> to vector<8x4xf32>
    %21 = arith.addf %18, %20 : vector<8x4xf32>
    %c0_17 = arith.constant 0 : index
    %c0_18 = arith.constant 0 : index
    %22 = vector.load %arg8[%c0_17, %c0_18] : memref<8x4xf32, #tpu.memory_space<vmem>>, vector<8x4xf32>
    tpu.vector_store %arg8[%c0_17, %c0_18], %21 {strides = array<i32>} : memref<8x4xf32, #tpu.memory_space<vmem>>, vector<8x4xf32>,
    return
  }
  func.func @transform_0(%arg0: i32) -> (i32, i32) {
    %c0_i32 = arith.constant 0 : i32
    %c0_i32_0 = arith.constant 0 : i32
    return %arg0, %c0_i32 : i32, i32
  }
  func.func @transform_1(%arg0: i32) -> (i32, i32) {
    %c0_i32 = arith.constant 0 : i32
    %c0_i32_0 = arith.constant 0 : i32
    %c0_i32_1 = arith.constant 0 : i32
    return %c0_i32, %c0_i32_0 : i32, i32
  }
  func.func @transform_2(%arg0: i32) -> (i32, i32) {
    %c0_i32 = arith.constant 0 : i32
    %c0_i32_0 = arith.constant 0 : i32
    %c0_i32_1 = arith.constant 0 : i32
    return %c0_i32, %c0_i32_0 : i32, i32
  }
  func.func @transform_3(%arg0: i32) -> (i32, i32) {
    %c0_i32 = arith.constant 0 : i32
    %c0_i32_0 = arith.constant 0 : i32
    %c0_i32_1 = arith.constant 0 : i32
    return %c0_i32, %c0_i32_0 : i32, i32
  }
  func.func @transform_4(%arg0: i32) -> (i32, i32) {
    %c0_i32 = arith.constant 0 : i32
    %c0_i32_0 = arith.constant 0 : i32
    %c0_i32_1 = arith.constant 0 : i32
    return %c0_i32, %c0_i32_0 : i32, i32
  }
  func.func @transform_5(%arg0: i32) -> (i32, i32) {
    %c0_i32 = arith.constant 0 : i32
    %c0_i32_0 = arith.constant 0 : i32
    %c0_i32_1 = arith.constant 0 : i32
    return %c0_i32, %c0_i32_0 : i32, i32
  }
  func.func @transform_6(%arg0: i32) -> (i32, i32) {
    %c0_i32 = arith.constant 0 : i32
    %c0_i32_0 = arith.constant 0 : i32
    %c0_i32_1 = arith.constant 0 : i32
    return %c0_i32, %c0_i32_0 : i32, i32
  }
  func.func @transform_7(%arg0: i32) -> (i32, i32) {
    %c0_i32 = arith.constant 0 : i32
    %c0_i32_0 = arith.constant 0 : i32
    return %arg0, %c0_i32 : i32, i32
  }
}

</mosaic_0001>

<bundles_post_ra>
// kernel: qnetwork_forward.1
= control target key start
LH: loop header
LB: loop body
LE: loop exit
PB: predicated region body
PF: predicated region fallthrough
CT: control target
= control target key end

     0   :  { %vm40_vm0 = vcmask 1043456   ;;  %v373_v0 = vmov 0.0   ;;  %vm374_vm1 = vmmov 0   ;;  %vm36_vm2 = vcmask 64512   ;;  %s469_s1 = inlined_call_operand.vmem [shape: bf16[8,64], index: 1, kind: input, shape index: {}]   ;;  %s470_s0 = inlined_call_operand.vmem [shape: bf16[8,8], index: 0, kind: input, shape index: {}]   ;;  %s471_s3 = inlined_call_operand.vmem [shape: bf16[64,128], index: 3, kind: input, shape index: {}]   ;;  %s472_s5 = inlined_call_operand.vmem [shape: bf16[128,4], index: 5, kind: input, shape index: {}]   ;;  %s473_s2 = inlined_call_operand.vmem [shape: f32[1,64], index: 2, kind: input, shape index: {}]   ;;  %s474_s4 = inlined_call_operand.vmem [shape: f32[1,128], index: 4, kind: input, shape index: {}]   ;;  %s475_s6 = inlined_call_operand.vmem [shape: f32[1,4], index: 6, kind: input, shape index: {}]   ;;  %s476_s7 = inlined_call_operand.vmem [shape: f32[8,4], index: 7, kind: output, shape index: {}]  }
   0x1   :  { %321 = vmatprep.subr.bf16.mxu1 %v373_v0  ;;  %v28_v1 = vld [vmem:[%s469_s1] sm:$0xf]  ;;  %323 = vmatprep.mubr.msk.bf16.mxu1 %vm374_vm1, %v373_v0  ;;  %v362_v5 = vld [vmem:[%s471_s3 + $0x8] sm:$0xff]   ;;  %v363_v6 = vld [vmem:[%s471_s3 + $0x10] sm:$0xff]   ;;  %vm125_vm3 = vcmask 523264   ;;  %vm282_vm4 = vcmask 31744  }
   0x2   :  { %v42_v2 = vsel %vm40_vm0, %v28_v1, 0  ;;  %339 = vmatprep.subr.bf16.mxu0 %v373_v0  ;;  %355 = vmatprep.mubr.msk.bf16.mxu0 %vm374_vm1, %v373_v0  ;;  %v27_v3 = vld [vmem:[%s470_s0] sm:$0xf]  ;;  %v364_v7 = vld [vmem:[%s471_s3 + $0x18] sm:$0xff]   ;;  %v366_v9 = vld [vmem:[%s472_s5 + $0x8] sm:$0xff]  }
   0x3   :  { %322 = vmatpush3.bf16.msra.mxu1 %v42_v2  ;;  %v361_v4 = vld [vmem:[%s471_s3] sm:$0xff]   ;;  %v367_v10 = vld [vmem:[%s472_s5 + $0x10] sm:$0xff]   ;;  %v368_v11 = vld [vmem:[%s472_s5 + $0x18] sm:$0xff]  }
   0x4   :  { %327 = vmatprep.subr.bf16.mxu1 %v373_v0  ;;  %v365_v8 = vld [vmem:[%s472_s5] sm:$0xff]   ;;  %v370_v13 = vld [vmem:[%s472_s5 + $0x28] sm:$0xff]   ;;  %v371_v22 = vld [vmem:[%s472_s5 + $0x30] sm:$0xff]  }
   0x5   :  { %340 = vmatpush3.bf16.msra.mxu0 %v365_v8  ;;  %v369_v12 = vld [vmem:[%s472_s5 + $0x20] sm:$0xff]   ;;  %v372_v23 = vld [vmem:[%s472_s5 + $0x38] sm:$0xff]  }
   0x6   :  { %324 = vmatmul.mubr.msk.bf16.vlgmr.msra.gmra.mrb[0].mxu1 %vm36_vm2, %v27_v3  ;;  %341 = vmatprep.subr.bf16.mxu0 %v373_v0  ;;  %v288_v14 = vld [vmem:[%s473_s2] ss:$0 sm:$0xff] }
   0x7   :  { %328 = vmatpush3.bf16.msra.mxu1 %v361_v4  ;;  %335 = vmatprep.mubr.msk.bf16.mxu1 %vm374_vm1, %v373_v0  ;;  %v290_v24 = vld [vmem:[%s474_s4] ss:$0 sm:$0xff] }
   0x8   :  { %329 = vmatprep.subr.bf16.mxu1 %v373_v0  ;;  %v296_v32 = vld [vmem:[%s475_s6] ss:$0 sm:$0xff] }
   0x9   :  { %342 = vmatpush3.bf16.msra.mxu0 %v366_v9 }
   0xa   :  { %343 = vmatprep.subr.bf16.mxu0 %v373_v0 }
   0xb   :  { %330 = vmatpush3.bf16.msra.mxu1 %v362_v5 }
   0xc   :  { %331 = vmatprep.subr.bf16.mxu1 %v373_v0 }
   0xd   :  { %344 = vmatpush3.bf16.msra.mxu0 %v367_v10 }
   0xe   :  { %345 = vmatprep.subr.bf16.mxu0 %v373_v0 }
   0xf   :  { %332 = vmatpush3.bf16.msra.mxu1 %v363_v6 }
  0x10   :  { %333 = vmatprep.subr.bf16.mxu1 %v373_v0 }
  0x11   :  { %346 = vmatpush3.bf16.msra.mxu0 %v368_v11 }
  0x12   :  { %347 = vmatprep.subr.bf16.mxu0 %v373_v0 }
  0x13   :  { %334 = vmatpush3.bf16.msra.mxu1 %v364_v7 }
  0x15   :  { %348 = vmatpush3.bf16.msra.mxu0 %v369_v12 }
  0x16   :  { %349 = vmatprep.subr.bf16.mxu0 %v373_v0 }
  0x19   :  { %350 = vmatpush3.bf16.msra.mxu0 %v370_v13 }
  0x1a   :  { %351 = vmatprep.subr.bf16.mxu0 %v373_v0 }
  0x1d   :  { %352 = vmatpush3.bf16.msra.mxu0 %v371_v22 }
  0x1e   :  { %353 = vmatprep.subr.bf16.mxu0 %v373_v0 }
  0x21   :  { %354 = vmatpush3.bf16.msra.mxu0 %v372_v23 }
  0xd9   :  { %v78_v15 = vpop.f32.mrb[0].mxu1 }
  0xda   :  { %v79_v16 = vadd.f32 %v288_v14, %v78_v15  ;;  %v325_v17 = vpop.f32.mrb[1].mxu1 }
  0xdb   :  { %v81_v18 = vpop.f32.mrb[2].mxu1 }
  0xdc   :  { %v84_v19 = vmax.f32 %v79_v16, 0.0  ;;  %v326_v20 = vpop.f32.mrb[3].mxu1 }
  0xde   :  { %v85_v21 = vpack.c.bf16 %v84_v19, %v84_v19 }
  0xe0   :  { %336 = vmatmul.mubr.msk.bf16.vlgmr.msra.gmra.mrb[4].mxu1 %vm125_vm3, %v85_v21 }
 0x1b3   :  { %v163_v25 = vpop.f32.mrb[4].mxu1 }
 0x1b4   :  { %v164_v26 = vadd.f32 %v290_v24, %v163_v25  ;;  %v337_v27 = vpop.f32.mrb[5].mxu1 }
 0x1b5   :  { %v166_v28 = vpop.f32.mrb[6].mxu1 }
 0x1b6   :  { %v169_v29 = vmax.f32 %v164_v26, 0.0  ;;  %v338_v30 = vpop.f32.mrb[7].mxu1 }
 0x1b8   :  { %v170_v31 = vpack.c.bf16 %v169_v29, %v169_v29 }
 0x1ba   :  { %356 = vmatmul.mubr.bf16.vlgmr.msra.gmra.mrb[0].mxu0 %v170_v31 }
 0x28d   :  { %v276_v33 = vpop.f32.mrb[0].mxu0 }
 0x28e   :  { %v277_v34 = vadd.f32 %v296_v32, %v276_v33  ;;  %v357_v35 = vpop.f32.mrb[1].mxu0 }
 0x28f   :  { %v279_v36 = vpop.f32.mrb[2].mxu0 }
 0x290   :  { %283 = vst.msk [vmem:[%s476_s7] sm:$0xff] %vm282_vm4, %v277_v34  ;;  %v358_v37 = vpop.f32.mrb[3].mxu0 }

</bundles_post_ra>
